<compile_context>
chip_gen: v6e
topology: v6e:2x2x1
jax: 0.10.0
libtpu: 0.0.40
codegen_flags: <defaults>
</compile_context>

<pallas_src>
import functools

import jax
import jax.numpy as jnp
from jax import lax
from jax.experimental import pallas as pl
from jax.experimental.pallas import tpu as pltpu

BN_EPS = 1e-5
_LANE = 128
_SUBLANE = 8


def _round_up(a, b):
    return (a + b - 1) // b * b


def _score_embedding_kernel(x_ref, wexp_ref, sel_ref, gamma_ref, beta_ref, o_ref,
                            pooled_acc, *, n_true, hw_true):
    # x_ref:      (NC_pad, hw_tile)   input tile (native dtype)
    # wexp_ref:   (NC_pad, OUT_pad)   Linear weight tiled per batch row-group (f32)
    # sel_ref:    (N_pad, NC_pad)     row-group selector matrix (f32)
    # gamma_ref:  (1, OUT_pad)        BN scale   beta_ref: (1, OUT_pad) BN shift
    # o_ref:      (N_pad, OUT_pad)    output (written once, in the finalize phase)
    # pooled_acc: (NC_pad, 1) f32     streaming spatial-sum accumulator (VMEM scratch)
    t = pl.program_id(0)

    @pl.when(t == 0)
    def _init():
        pooled_acc[...] = jnp.zeros_like(pooled_acc)

    # AdaptiveAvgPool2d((1,1)) as a streaming sum over spatial tiles.
    # Cast to f32 *after* the HBM read; accumulate in f32 (safe for bf16 inputs).
    xb = x_ref[...].astype(jnp.float32)                         # (NC_pad, hw_tile)
    pooled_acc[...] += jnp.sum(xb, axis=-1, keepdims=True)      # (NC_pad, 1)

    @pl.when(t == pl.num_programs(0) - 1)
    def _finalize():
        pooled = pooled_acc[...] * (1.0 / float(hw_true))       # spatial mean, (NC_pad, 1)

        # Linear(C -> OUT, bias=False):  y[b, o] = sum_c pooled[b*C + c] * W[o, c]
        # = sel @ (pooled * W_exp) — broadcast-mul on the VPU + one tiny finalize matmul,
        # no in-kernel lane<->sublane reshape of the pooled vector.
        p = pooled * wexp_ref[...]                              # (NC_pad, OUT_pad)
        y = jnp.dot(sel_ref[...], p,
                    preferred_element_type=jnp.float32)         # (N_pad, OUT_pad)

        # BatchNorm1d, training mode: batch mean / biased variance over the true N rows.
        # Padded batch rows of y are exactly zero (zero rows in W_exp / sel); mask them.
        inv_n = 1.0 / float(n_true)
        mean = jnp.sum(y, axis=0, keepdims=True) * inv_n        # (1, OUT_pad)
        row_ids = lax.broadcasted_iota(jnp.int32, y.shape, 0)
        d = jnp.where(row_ids < n_true, y - mean, 0.0)
        var = jnp.sum(d * d, axis=0, keepdims=True) * inv_n
        z = d * lax.rsqrt(var + BN_EPS) * gamma_ref[...] + beta_ref[...]

        o_ref[...] = jax.nn.sigmoid(z)                          # lane-dense (8,128) store


def score_embedding_forward(x_nchw, weight_out_in, gamma, beta):
    """x_nchw: (N, C, H, W); weight_out_in: (OUT, C) torch-Linear layout;
    gamma/beta: (OUT,) BatchNorm1d affine params.  Returns (N, OUT) float32."""
    n, c, h, w = x_nchw.shape
    out_ch = weight_out_in.shape[0]
    hw = h * w
    nc = n * c

    nc_pad = _round_up(nc, _SUBLANE)
    n_pad = _round_up(n, _SUBLANE)
    out_pad = _round_up(out_ch, _LANE)

    # (N*C, H*W): free view of contiguous NCHW; keep the caller's dtype (no host upcast).
    x2 = x_nchw.reshape(nc, hw)
    if nc_pad != nc:
        x2 = jnp.pad(x2, ((0, nc_pad - nc), (0, 0)))

    # Spatial tile: as wide as possible (amortize per-step pipeline overhead) while one
    # block stays <= ~8 MiB so double-buffering fits every generation's scoped VMEM.
    itemsize = jnp.dtype(x2.dtype).itemsize
    target_block_bytes = 8 * 1024 * 1024
    max_tile = max(_LANE, (target_block_bytes // (nc_pad * itemsize)) // _LANE * _LANE)
    hw_tile = min(_round_up(hw, _LANE), max_tile)
    hw_padded = _round_up(hw, hw_tile)
    if hw_padded != hw:
        # Zero pad: padded columns add 0 to the sum; the kernel divides by the true H*W.
        x2 = jnp.pad(x2, ((0, 0), (0, hw_padded - hw)))
    num_tiles = hw_padded // hw_tile

    # Linear weight tiled per batch row-group, zero-padded to lane-dense (NC_pad, OUT_pad).
    wt = jnp.transpose(weight_out_in).astype(jnp.float32)           # (C, OUT)
    wt = jnp.pad(wt, ((0, 0), (0, out_pad - out_ch)))
    w_exp = jnp.tile(wt, (n, 1))                                     # (N*C, OUT_pad)
    w_exp = jnp.pad(w_exp, ((0, nc_pad - nc), (0, 0)))               # zero pad rows

    # Row-group selector: sel[b, r] = 1 iff pooled row r belongs to batch element b.
    group_of_row = jnp.arange(nc_pad, dtype=jnp.int32) // c
    sel = (group_of_row[None, :] == jnp.arange(n_pad, dtype=jnp.int32)[:, None])
    sel = sel.astype(jnp.float32)                                    # (N_pad, NC_pad)

    gamma2 = jnp.pad(gamma.astype(jnp.float32).reshape(1, out_ch),
                     ((0, 0), (0, out_pad - out_ch)))
    beta2 = jnp.pad(beta.astype(jnp.float32).reshape(1, out_ch),
                    ((0, 0), (0, out_pad - out_ch)))

    kernel = functools.partial(_score_embedding_kernel, n_true=n, hw_true=hw)

    cost = pl.CostEstimate(
        flops=int(nc * hw + 2 * n * c * out_ch + 10 * n * out_ch),
        transcendentals=int(n * out_ch + out_ch),
        bytes_accessed=int(x2.size * itemsize + w_exp.size * 4 + sel.size * 4
                           + 2 * out_pad * 4 + n_pad * out_pad * 4),
    )

    out_padded = pl.pallas_call(
        kernel,
        out_shape=jax.ShapeDtypeStruct((n_pad, out_pad), jnp.float32),
        grid_spec=pltpu.PrefetchScalarGridSpec(
            num_scalar_prefetch=0,
            grid=(num_tiles,),                                # spatial reduction axis
            in_specs=[
                pl.BlockSpec((nc_pad, hw_tile), lambda t: (0, t)),   # x tiles (pipelined)
                pl.BlockSpec((nc_pad, out_pad), lambda t: (0, 0)),   # W_exp (fetched once)
                pl.BlockSpec((n_pad, nc_pad), lambda t: (0, 0)),     # selector
                pl.BlockSpec((1, out_pad), lambda t: (0, 0)),        # gamma
                pl.BlockSpec((1, out_pad), lambda t: (0, 0)),        # beta
            ],
            out_specs=pl.BlockSpec((n_pad, out_pad), lambda t: (0, 0)),
            scratch_shapes=[pltpu.VMEM((nc_pad, 1), jnp.float32)],
        ),
        compiler_params=pltpu.CompilerParams(
            # Pool -> Linear -> BatchNorm couples all tiles: single sequential axis.
            dimension_semantics=("arbitrary",),
            vmem_limit_bytes=48 * 1024 * 1024,
        ),
        cost_estimate=cost,
    )(x2, w_exp, sel, gamma2, beta2)

    return out_padded[:n, :out_ch]


def _reference(x_nchw, weight_out_in, gamma, beta):
    pooled = jnp.mean(x_nchw.astype(jnp.float32), axis=(2, 3))       # (N, C)
    y = pooled @ weight_out_in.astype(jnp.float32).T                 # (N, OUT)
    mean = jnp.mean(y, axis=0, keepdims=True)
    var = jnp.mean((y - mean) ** 2, axis=0, keepdims=True)
    z = (y - mean) / jnp.sqrt(var + BN_EPS) * gamma[None, :] + beta[None, :]
    return jax.nn.sigmoid(z)


if __name__ == "__main__":
    key = jax.random.PRNGKey(0)
    N, C_IN, C_OUT, H, W = 2, 4, 8, 16, 16

    k_x, k_w = jax.random.split(key)
    x = jax.random.normal(k_x, (N, C_IN, H, W), dtype=jnp.float32)
    # Deterministic synthetic Linear weight (torch layout: (out, in)), bias-free.
    weight = 0.1 * jax.random.normal(k_w, (C_OUT, C_IN), dtype=jnp.float32)
    # BatchNorm1d default init: gamma=1, beta=0.
    gamma = jnp.ones((C_OUT,), dtype=jnp.float32)
    beta = jnp.zeros((C_OUT,), dtype=jnp.float32)

    out = score_embedding_forward(x, weight, gamma, beta)
    out = jax.block_until_ready(out)

    ref = _reference(x, weight, gamma, beta)
    assert out.shape == (N, C_OUT)
    assert jnp.allclose(out, ref, atol=1e-5, rtol=1e-5), (out, ref)

    print("KERNEL_OK")
</pallas_src>

<mosaic_0001>
module attributes {stable_mosaic.version = 11 : i64} {
  func.func @_score_embedding_kernel(%arg0: i32, %arg1: memref<8x256xf32, #tpu.memory_space<vmem>>, %arg2: memref<8x128xf32, #tpu.memory_space<vmem>>, %arg3: memref<8x8xf32, #tpu.memory_space<vmem>>, %arg4: memref<1x128xf32, #tpu.memory_space<vmem>>, %arg5: memref<1x128xf32, #tpu.memory_space<vmem>>, %arg6: memref<8x128xf32, #tpu.memory_space<vmem>>, %arg7: memref<8x1xf32, #tpu.memory_space<vmem>>) attributes {dimension_semantics = [#tpu.dimension_semantics<arbitrary>], iteration_bounds = array<i64: 1>, scalar_prefetch = 0 : i64, scratch_operands = 1 : i64, tpu.core_type = #tpu.core_type<tc>, window_params = [{transform_indices = @transform_0, window_bounds = array<i64: 8, 256>}, {pipeline_mode = #tpu.pipeline_mode<synchronous>, transform_indices = @transform_1, window_bounds = array<i64: 8, 128>}, {pipeline_mode = #tpu.pipeline_mode<synchronous>, transform_indices = @transform_2, window_bounds = array<i64: 8, 8>}, {pipeline_mode = #tpu.pipeline_mode<synchronous>, transform_indices = @transform_3, window_bounds = array<i64: 1, 128>}, {pipeline_mode = #tpu.pipeline_mode<synchronous>, transform_indices = @transform_4, window_bounds = array<i64: 1, 128>}, {pipeline_mode = #tpu.pipeline_mode<synchronous>, transform_indices = @transform_5, window_bounds = array<i64: 8, 128>}]} {
    %c0_i32 = arith.constant 0 : i32
    %0 = arith.cmpi eq, %arg0, %c0_i32 : i32
    %1 = arith.extui %0 : i1 to i32
    %c0_i32_0 = arith.constant 0 : i32
    %2 = arith.cmpi ne, %1, %c0_i32_0 : i32
    scf.if %2 {
      %cst_8 = arith.constant 0.000000e+00 : f32
      %12 = vector.broadcast %cst_8 : f32 to vector<8x1xf32>
      %c0_9 = arith.constant 0 : index
      %c0_10 = arith.constant 0 : index
      %13 = vector.load %arg7[%c0_9, %c0_10] : memref<8x1xf32, #tpu.memory_space<vmem>>, vector<8x1xf32>
      tpu.vector_store %arg7[%c0_9, %c0_10], %12 {strides = array<i32>} : memref<8x1xf32, #tpu.memory_space<vmem>>, vector<8x1xf32>,
    } else {
    }
    %c0 = arith.constant 0 : index
    %c0_1 = arith.constant 0 : index
    %3 = vector.load %arg1[%c0, %c0_1] : memref<8x256xf32, #tpu.memory_space<vmem>>, vector<8x256xf32>
    %c0_2 = arith.constant 0 : index
    %c0_3 = arith.constant 0 : index
    %4 = vector.load %arg7[%c0_2, %c0_3] : memref<8x1xf32, #tpu.memory_space<vmem>>, vector<8x1xf32>
    %cst = arith.constant dense<0.000000e+00> : vector<8xf32>
    %5 = vector.multi_reduction <add>, %3, %cst [1] : vector<8x256xf32> to vector<8xf32>
    %6 = vector.shape_cast %5 : vector<8xf32> to vector<8x1xf32>
    %7 = arith.addf %4, %6 : vector<8x1xf32>
    %c0_4 = arith.constant 0 : index
    %c0_5 = arith.constant 0 : index
    %8 = vector.load %arg7[%c0_4, %c0_5] : memref<8x1xf32, #tpu.memory_space<vmem>>, vector<8x1xf32>
    tpu.vector_store %arg7[%c0_4, %c0_5], %7 {strides = array<i32>} : memref<8x1xf32, #tpu.memory_space<vmem>>, vector<8x1xf32>,
    %c0_i32_6 = arith.constant 0 : i32
    %9 = arith.cmpi eq, %arg0, %c0_i32_6 : i32
    %10 = arith.extui %9 : i1 to i32
    %c0_i32_7 = arith.constant 0 : i32
    %11 = arith.cmpi ne, %10, %c0_i32_7 : i32
    scf.if %11 {
      %c0_8 = arith.constant 0 : index
      %c0_9 = arith.constant 0 : index
      %12 = vector.load %arg7[%c0_8, %c0_9] : memref<8x1xf32, #tpu.memory_space<vmem>>, vector<8x1xf32>
      %cst_10 = arith.constant 3.906250e-03 : f32
      %13 = vector.broadcast %cst_10 : f32 to vector<8x1xf32>
      %14 = arith.mulf %12, %13 : vector<8x1xf32>
      %c0_11 = arith.constant 0 : index
      %c0_12 = arith.constant 0 : index
      %15 = vector.load %arg2[%c0_11, %c0_12] : memref<8x128xf32, #tpu.memory_space<vmem>>, vector<8x128xf32>
      %16 = vector.broadcast %14 : vector<8x1xf32> to vector<8x128xf32>
      %17 = arith.mulf %16, %15 : vector<8x128xf32>
      %c0_13 = arith.constant 0 : index
      %c0_14 = arith.constant 0 : index
      %18 = vector.load %arg3[%c0_13, %c0_14] : memref<8x8xf32, #tpu.memory_space<vmem>>, vector<8x8xf32>
      %cst_15 = arith.constant dense<0.000000e+00> : vector<8x128xf32>
      %19 = tpu.matmul %18, %17, %cst_15 {dimension_numbers = #tpu.dot_dimension_numbers<[1], [0], [0], [1], [0, 0, 1, 1], [], []>} : vector<8x8xf32>, vector<8x128xf32>, vector<8x128xf32> -> vector<8x128xf32>
      %cst_16 = arith.constant dense<0.000000e+00> : vector<128xf32>
      %20 = vector.multi_reduction <add>, %19, %cst_16 [0] : vector<8x128xf32> to vector<128xf32>
      %21 = vector.shape_cast %20 : vector<128xf32> to vector<1x128xf32>
      %cst_17 = arith.constant 5.000000e-01 : f32
      %22 = vector.broadcast %cst_17 : f32 to vector<1x128xf32>
      %23 = arith.mulf %21, %22 : vector<1x128xf32>
      %24 = tpu.iota {dimensions = array<i32: 0>} : vector<8x128xi32>
      %c2_i32 = arith.constant 2 : i32
      %25 = vector.broadcast %c2_i32 : i32 to vector<8x128xi32>
      %26 = arith.cmpi slt, %24, %25 : vector<8x128xi32>
      %27 = vector.broadcast %23 : vector<1x128xf32> to vector<8x128xf32>
      %28 = arith.subf %19, %27 : vector<8x128xf32>
      %cst_18 = arith.constant 0.000000e+00 : f32
      %29 = vector.broadcast %cst_18 : f32 to vector<8x128xf32>
      %30 = arith.select %26, %28, %29 : vector<8x128xi1>, vector<8x128xf32>
      %31 = arith.mulf %30, %30 : vector<8x128xf32>
      %cst_19 = arith.constant dense<0.000000e+00> : vector<128xf32>
      %32 = vector.multi_reduction <add>, %31, %cst_19 [0] : vector<8x128xf32> to vector<128xf32>
      %33 = vector.shape_cast %32 : vector<128xf32> to vector<1x128xf32>
      %cst_20 = arith.constant 5.000000e-01 : f32
      %34 = vector.broadcast %cst_20 : f32 to vector<1x128xf32>
      %35 = arith.mulf %33, %34 : vector<1x128xf32>
      %cst_21 = arith.constant 9.99999974E-6 : f32
      %36 = vector.broadcast %cst_21 : f32 to vector<1x128xf32>
      %37 = arith.addf %35, %36 : vector<1x128xf32>
      %38 = math.rsqrt %37 : vector<1x128xf32>
      %39 = vector.broadcast %38 : vector<1x128xf32> to vector<8x128xf32>
      %40 = arith.mulf %30, %39 : vector<8x128xf32>
      %c0_22 = arith.constant 0 : index
      %c0_23 = arith.constant 0 : index
      %41 = vector.load %arg4[%c0_22, %c0_23] : memref<1x128xf32, #tpu.memory_space<vmem>>, vector<1x128xf32>
      %42 = vector.broadcast %41 : vector<1x128xf32> to vector<8x128xf32>
      %43 = arith.mulf %40, %42 : vector<8x128xf32>
      %c0_24 = arith.constant 0 : index
      %c0_25 = arith.constant 0 : index
      %44 = vector.load %arg5[%c0_24, %c0_25] : memref<1x128xf32, #tpu.memory_space<vmem>>, vector<1x128xf32>
      %45 = vector.broadcast %44 : vector<1x128xf32> to vector<8x128xf32>
      %46 = arith.addf %43, %45 : vector<8x128xf32>
      %47 = arith.negf %46 : vector<8x128xf32>
      %48 = math.exp %47 : vector<8x128xf32>
      %cst_26 = arith.constant 1.000000e+00 : f32
      %49 = vector.broadcast %cst_26 : f32 to vector<8x128xf32>
      %50 = arith.addf %49, %48 : vector<8x128xf32>
      %51 = arith.divf %49, %50 : vector<8x128xf32>
      %c0_27 = arith.constant 0 : index
      %c0_28 = arith.constant 0 : index
      %52 = vector.load %arg6[%c0_27, %c0_28] : memref<8x128xf32, #tpu.memory_space<vmem>>, vector<8x128xf32>
      tpu.vector_store %arg6[%c0_27, %c0_28], %51 {strides = array<i32>} : memref<8x128xf32, #tpu.memory_space<vmem>>, vector<8x128xf32>,
    } else {
    }
    return
  }
  func.func @transform_0(%arg0: i32) -> (i32, i32) {
    %c0_i32 = arith.constant 0 : i32
    %c0_i32_0 = arith.constant 0 : i32
    return %c0_i32, %arg0 : i32, i32
  }
  func.func @transform_1(%arg0: i32) -> (i32, i32) {
    %c0_i32 = arith.constant 0 : i32
    %c0_i32_0 = arith.constant 0 : i32
    %c0_i32_1 = arith.constant 0 : i32
    return %c0_i32, %c0_i32_0 : i32, i32
  }
  func.func @transform_2(%arg0: i32) -> (i32, i32) {
    %c0_i32 = arith.constant 0 : i32
    %c0_i32_0 = arith.constant 0 : i32
    %c0_i32_1 = arith.constant 0 : i32
    return %c0_i32, %c0_i32_0 : i32, i32
  }
  func.func @transform_3(%arg0: i32) -> (i32, i32) {
    %c0_i32 = arith.constant 0 : i32
    %c0_i32_0 = arith.constant 0 : i32
    %c0_i32_1 = arith.constant 0 : i32
    return %c0_i32, %c0_i32_0 : i32, i32
  }
  func.func @transform_4(%arg0: i32) -> (i32, i32) {
    %c0_i32 = arith.constant 0 : i32
    %c0_i32_0 = arith.constant 0 : i32
    %c0_i32_1 = arith.constant 0 : i32
    return %c0_i32, %c0_i32_0 : i32, i32
  }
  func.func @transform_5(%arg0: i32) -> (i32, i32) {
    %c0_i32 = arith.constant 0 : i32
    %c0_i32_0 = arith.constant 0 : i32
    %c0_i32_1 = arith.constant 0 : i32
    return %c0_i32, %c0_i32_0 : i32, i32
  }
}

</mosaic_0001>

<bundles_post_ra>
// kernel: tpu_custom_call.1
= control target key start
LH: loop header
LB: loop body
LE: loop exit
PB: predicated region body
PF: predicated region fallthrough
CT: control target
= control target key end

     0   :  { %10 = vsyncpa [#allocation4], 0  ;;  %s386_s0 = inlined_call_operand.hbm [shape: f32[8,256], index: 0, kind: input, shape index: {}]   ;;  %s387_s1 = inlined_call_operand.hbm [shape: f32[8,128], index: 1, kind: input, shape index: {}]   ;;  %s388_s2 = inlined_call_operand.hbm [shape: f32[8,8], index: 2, kind: input, shape index: {}]   ;;  %s389_s3 = inlined_call_operand.vmem [shape: f32[1,128], index: 3, kind: input, shape index: {}]   ;;  %s390_s4 = inlined_call_operand.vmem [shape: f32[1,128], index: 4, kind: input, shape index: {}]   ;;  %s391_s5 = inlined_call_operand.hbm [shape: f32[8,128], index: 5, kind: output, shape index: {}]  }
   0x1   :  { %11 = vsyncpa [#allocation7], 0 }
   0x2   :  { %12 = vsyncpa [#allocation5], 0  ;;  %s331_s18 = smov [#allocation6]   ;;  %s332_s20 = smov [#allocation3]  }
   0x3   :  { %s29_s19 = sshll.u32 %s331_s18, 4  ;;  %s19_s21 = sshll.u32 %s332_s20, 4  ;;  %s30_s19 = int_to_ptr.vmem [resolvable:$true] %s29_s19  ;;  %s20_s21 = int_to_ptr.vmem [resolvable:$true] %s19_s21 }
   0x4   :  { %s253_s22 = scalar_lea.vmem %s30_s19, 128  ;;  %p258_p1 = scmp.lt.s32.totalorder %s30_s19, %s30_s19 }
   0x5   :  { %p254_p0 = scmp.ne.s32.totalorder %s30_s19, %s253_s22  ;;  %p259_p2 = scmp.lt.s32.totalorder %s253_s22, %s253_s22 }
   0x7   :  { %p260_p3 = por %p259_p2, %p258_p1 }
   0x9   :  { %p261_p4 = pnand %p260_p3, %p254_p0 }
   0xb   :  { %264 = shalt.err (!%p261_p4)
}
   0xc   :  { %32 = dma.hbm_to_vmem [thread:$0]  %s387_s1, 128, %s30_s19, [#allocation7]  }
   0xd   :  { %s273_s25 = scalar_lea.vmem %s20_s21, 256  ;;  %p278_p6 = scmp.lt.s32.totalorder %s20_s21, %s20_s21 }
   0xe   :  { %p274_p5 = scmp.ne.s32.totalorder %s20_s21, %s273_s25  ;;  %p279_p7 = scmp.lt.s32.totalorder %s273_s25, %s273_s25 }
  0x10   :  { %p280_p8 = por %p279_p7, %p278_p6 }
  0x12   :  { %p281_p9 = pnand %p280_p8, %p274_p5 }
  0x14   :  { %284 = shalt.err (!%p281_p9)
}
  0x15   :  { %22 = dma.hbm_to_vmem [thread:$0]  %s386_s0, 256, %s20_s21, [#allocation4]  }
  0x16   :  { %s333_s28 = smov [#allocation8]  }
  0x17   :  { %s39_s29 = sshll.u32 %s333_s28, 4  ;;  %s40_s29 = int_to_ptr.vmem [resolvable:$true] %s39_s29 }
  0x18   :  { %s293_s30 = scalar_lea.vmem %s40_s29, 128  ;;  %p298_p11 = scmp.lt.s32.totalorder %s40_s29, %s40_s29 }
  0x19   :  { %p294_p10 = scmp.ne.s32.totalorder %s40_s29, %s293_s30  ;;  %p299_p12 = scmp.lt.s32.totalorder %s293_s30, %s293_s30 }
  0x1b   :  { %p300_p13 = por %p299_p12, %p298_p11 }
  0x1d   :  { %p301_p0 = pnand %p300_p13, %p294_p10 }
  0x1f   :  { %304 = shalt.err (!%p301_p0)
}
  0x20   :  { %42 = dma.hbm_to_vmem [thread:$0]  %s388_s2, 128, %s40_s29, [#allocation7]  }
  0x21   :  { %325 = dma.done.wait [#allocation4], 256  }
  0x22   :  { %326 = vsyncadd [#allocation4], 4294967040 }
  0x23   :  { %327 = dma.done.wait [#allocation7], 256  }
  0x24   :  { %328 = vsyncadd [#allocation7], 4294967040  ;;  %vm60_vm0 = vcmask 7168   ;;  %v334_v0 = vmov 0.0   ;;  %v62_v1 = vld [vmem:[#allocation3] sm:$0xff]  ;;  %v63_v2 = vld [vmem:[#allocation3 + $0x8] sm:$0xff]  ;;  %v165_v19 = vlaneseq }
  0x25   :  { %61 = vst.msk [vmem:[#allocation2] sm:$0xff] %vm60_vm0, %v334_v0  ;;  %226 = vmatprep.subr.mxu0 %v334_v0  ;;  %v65_v3 = vadd.f32 %v63_v2, %v62_v1  ;;  %v335_v4 = vmov 0   ;;  %vm336_vm1 = vmmov 0   ;;  %v76_v10 = vld [vmem:[#allocation6] sm:$0xff]  ;;  %v83_v13 = vld [vmem:[#allocation8] sm:$0xff]  ;;  %vm84_vm2 = vcmask 64512  }
  0x26   :  { %238 = vset.pattern.permute.xlu0 %v335_v4  ;;  %228 = vmatprep.mubr.msk.f32.mxu0 %vm336_vm1, %v334_v0  ;;  %v166_v22 = vshrl.u32 %v165_v19, 7  ;;  %v221_v37 = vld [vmem:[%s389_s3] ss:$0 sm:$0xff]  ;;  %s337_s9 = smov [#allocation9]  }
  0x27   :  { %66 = vadd.xlane.f32.xlu0 %v65_v3  ;;  %v222_v39 = vld [vmem:[%s390_s4] ss:$0 sm:$0xff]  ;;  %s210_s10 = sshll.u32 %s337_s9, 4  ;;  %s211_s10 = int_to_ptr.vmem [resolvable:$true] %s210_s10 }
  0x28   :  { %vm167_vm3 = vcmp.lt.s32.totalorder %v166_v22, 2  ;;  %s305_s11 = scalar_lea.vmem %s211_s10, 128  ;;  %p310_p2 = scmp.lt.s32.totalorder %s211_s10, %s211_s10 }
  0x29   :  { %p306_p1 = scmp.ne.s32.totalorder %s211_s10, %s305_s11  ;;  %p311_p3 = scmp.lt.s32.totalorder %s305_s11, %s305_s11 }
  0x2b   :  { %p312_p4 = por %p311_p3, %p310_p2 }
  0x2c   :  { %v64_v5 = vld [vmem:[#allocation2] sm:$0xff] }
  0x2d   :  { %p313_p5 = pnand %p312_p4, %p306_p1 }
  0xb0   :  { %v67_v6 = vpop.xlane.xlu0 %66 }
  0xb1   :  { %v68_v7 = vadd.f32 %v67_v6, %v64_v5 }
  0xb3   :  { %70 = vst.msk [vmem:[#allocation2] sm:$0xff] %vm60_vm0, %v68_v7 }
  0xba   :  { %v74_v8 = vld [vmem:[#allocation2] sm:$0xff] }
  0xbb   :  { %v75_v9 = vmul.f32 0.00390625, %v74_v8 }
  0xbd   :  { %79 = vperm.xlu0 %238, %v75_v9  }
 0x138   :  { %v80_v11 = vpop.permute.xlu0 %79 }
 0x139   :  { %v82_v12 = vmul.f32 %v80_v11, %v76_v10 }
 0x13b   :  { %227 = vmatpush3.msra.mxu0 %v82_v12 }
 0x13c   :  { %229 = vmatmul.mubr.msk.f32.vlgmr.msra.gmra.mxu0 %vm84_vm2, %v83_v13 }
 0x1fc   :  { %v154_v14 = vpop.f32.mrf.mxu0 }
 0x1fd   :  { %v158_v15 = vrot.slane %v154_v14, 4 }
 0x1fe   :  { %v230_v16 = vpop.f32.mrf.mxu0 }
 0x1ff   :  { %v159_v17 = vadd.f32 %v158_v15, %v154_v14 }
 0x201   :  { %v160_v18 = vrot.slane %v159_v17, 2 }
 0x203   :  { %v161_v20 = vadd.f32 %v160_v18, %v159_v17 }
 0x205   :  { %v162_v21 = vrot.slane %v161_v20, 1 }
 0x207   :  { %v163_v23 = vadd.f32 %v162_v21, %v161_v20 }
 0x209   :  { %v164_v24 = vmul.f32 0.5, %v163_v23 }
 0x20b   :  { %v168_v25 = vsub.f32 %v154_v14, %v164_v24 }
 0x20d   :  { %v169_v26 = vsel %vm167_vm3, %v168_v25, 0.0 }
 0x20e   :  { %v170_v27 = vmul.f32 %v169_v26, %v169_v26 }
 0x210   :  { %v171_v28 = vrot.slane %v170_v27, 4 }
 0x212   :  { %v172_v29 = vadd.f32 %v171_v28, %v170_v27 }
 0x214   :  { %v173_v30 = vrot.slane %v172_v29, 2 }
 0x216   :  { %v174_v31 = vadd.f32 %v173_v30, %v172_v29 }
 0x218   :  { %v175_v32 = vrot.slane %v174_v31, 1 }
 0x21a   :  { %v176_v33 = vadd.f32 %v175_v32, %v174_v31 }
 0x21c   :  { %v177_v34 = vmul.f32 0.5, %v176_v33 }
 0x21e   :  { %v178_v35 = vadd.f32 1e-05, %v177_v34 }
 0x220   :  { %239 = vrsqrt.f32 %v178_v35 }
 0x22d   :  { %v240_v36 = vpop.eup %239 }
 0x22e   :  { %v180_v38 = vmul.f32 %v240_v36, %v169_v26 }
 0x230   :  { %v188_v40 = vmul.f32 %v221_v37, %v180_v38 }
 0x232   :  { %v196_v41 = vadd.f32 %v222_v39, %v188_v40 }
 0x234   :  { %v223_v42 = vmul.f32 -1.442695, %v196_v41 }
 0x236   :  { %241 = vpow2.f32 %v223_v42 }
 0x243   :  { %v242_v43 = vpop.eup %241 }
 0x244   :  { %v200_v44 = vadd.f32 1.0, %v242_v43 }
 0x246   :  { %243 = vrcp.f32 %v200_v44 }
 0x253   :  { %v244_v45 = vpop.eup %243 }
 0x254   :  { %203 = vst [vmem:[#allocation9] sm:$0xff] %v244_v45 }
 0x255   :  { %316 = shalt.err (!%p313_p5)
}
 0x256   :  { %213 = dma.vmem_to_hbm [thread:$0]  %s211_s10, 128, %s391_s5, [#allocation5]  }
 0x257   :  { %329 = dma.done.wait [#allocation5], 128  }
 0x258   :  { %330 = vsyncadd [#allocation5], 4294967168 }
 0x259   :  { %217 = vsyncpa [#allocation4], 1 }
 0x25a   :  { %218 = vsyncpa [#allocation7], 1 }
 0x25b   :  { %219 = vsyncpa [#allocation5], 1 }

</bundles_post_ra>
